<compile_context>
chip_gen: v7x
topology: tpu7x:2x2x1
jax: 0.10.0
libtpu: 0.0.40
codegen_flags: <defaults>
</compile_context>

<pallas_src>
import functools

import jax
import jax.numpy as jnp
from jax.experimental import pallas as pl
from jax.experimental.pallas import tpu as pltpu

BN_EPS = 1e-5
VMEM_LIMIT = 32 * 1024 * 1024   # fine on v5e (128 MiB phys) and within v7x scoped default
TILE_CAP = 2048                 # lane-dense, memory-bound regime -> big tiles


def _round_up(x, m):
    return ((x + m - 1) // m) * m


def _choose_tile(p, cap=TILE_CAP):
    # multiple of 128 (lane-dense), capped; boundary blocks handled in/by the kernel.
    return min(cap, _round_up(max(p, 1), 128))


def _fused_kernel(a1_ref, a2_ref, r_ref, w1_ref, w2_ref, g_ref, b_ref,
                  o_ref, sum_ref, sumsq_ref, *, n_stats, tp1, p1, inv_n):
    """Phased grid: [0, n_stats) = BN batch-stat accumulation, [n_stats, end) = apply."""
    i = pl.program_id(0)

    @pl.when(i == 0)
    def _():
        sum_ref[...] = jnp.zeros_like(sum_ref)
        sumsq_ref[...] = jnp.zeros_like(sumsq_ref)

    @pl.when(i < n_stats)
    def _():
        # conv1 (1x1 stride-2 == channel matmul) on this position tile: bf16 MXU, f32 acc.
        y = jnp.dot(w1_ref[...], a1_ref[...], preferred_element_type=jnp.float32)
        # Mask columns beyond the true position count (boundary block contents are
        # unspecified) so they don't pollute the batch statistics.
        valid = jnp.minimum(p1 - i * tp1, tp1)
        col = jax.lax.broadcasted_iota(jnp.int32, y.shape, 1)
        y = jnp.where(col < valid, y, 0.0)
        sum_ref[...] += jnp.sum(y, axis=1, keepdims=True)
        sumsq_ref[...] += jnp.sum(y * y, axis=1, keepdims=True)

    @pl.when(i >= n_stats)
    def _():
        # Fold BN batch stats -> scale/shift (f32, ~64 values: negligible per step).
        mean = sum_ref[...] * inv_n
        var = sumsq_ref[...] * inv_n - mean * mean          # biased variance
        scale = g_ref[...] * jax.lax.rsqrt(var + BN_EPS)
        shift = b_ref[...] - mean * scale
        # conv1 recomputed only at the even/even output positions (bf16, f32 acc).
        y = jnp.dot(w1_ref[...], a2_ref[...], preferred_element_type=jnp.float32)
        # BN apply + residual (bf16 DMA, widened here) + ReLU in f32.
        z = jnp.maximum(y * scale + shift + r_ref[...].astype(jnp.float32), 0.0)
        # conv2 (bf16, f32 acc).  Out-of-range boundary columns are clipped on write-back.
        o_ref[...] = jnp.dot(w2_ref[...], z.astype(jnp.bfloat16),
                             preferred_element_type=jnp.float32)


@jax.jit
def model_forward(x3, x13, w1, gamma, beta, w2):
    """x3: [1,32,H,W] NCHW, x13: [1,64,ceil(H/2),ceil(W/2)] NCHW.
    w1: torch conv weight [64,32,1,1]; w2: [128,64,1,1].
    Returns [1,128,ceil(H/4),ceil(W/4)] NCHW (f32)."""
    n, cin, H, W = x3.shape
    assert n == 1, "wrapper written for batch=1 (as in the torch module)"
    c_mid = w1.shape[0]   # 64
    cout = w2.shape[0]    # 128
    h1, w1_sp = -(-H // 2), -(-W // 2)          # ceil: matches torch 1x1 stride-2 conv
    h2, w2_sp = -(-h1 // 2), -(-w1_sp // 2)
    P1 = h1 * w1_sp
    P2 = h2 * w2_sp

    # Weights: torch [out,in,1,1] -> [out,in]; already channel-first, no transpose.
    w1m = w1[:, :, 0, 0].astype(jnp.bfloat16)   # (64, 32)
    w2m = w2[:, :, 0, 0].astype(jnp.bfloat16)   # (128, 64)
    g2 = gamma.reshape(c_mid, 1).astype(jnp.float32)
    b2 = beta.reshape(c_mid, 1).astype(jnp.float32)

    # Channel-first, spatially-flattened inputs. x3 is sliced exactly once; a2 is
    # derived from that slice. No padding, no extra de-pad pass on the output.
    x3e = x3[0, :, ::2, ::2]                                         # (cin, h1, w1_sp)
    a1 = x3e.reshape(cin, P1).astype(jnp.bfloat16)                   # conv1 input, all positions
    a2 = x3e[:, ::2, ::2].reshape(cin, P2).astype(jnp.bfloat16)      # conv1 input @ even/even outputs
    r2 = x13[0, :, ::2, ::2].reshape(c_mid, P2).astype(jnp.bfloat16) # residual @ even/even (bf16 DMA)

    tp1 = _choose_tile(P1)
    tp2 = _choose_tile(P2)
    n_stats = -(-P1 // tp1)
    n_apply = -(-P2 // tp2)

    kernel = functools.partial(_fused_kernel, n_stats=n_stats, tp1=tp1,
                               p1=P1, inv_n=1.0 / float(P1))

    out_flat = pl.pallas_call(
        kernel,
        out_shape=jax.ShapeDtypeStruct((cout, P2), jnp.float32),
        grid_spec=pltpu.PrefetchScalarGridSpec(
            num_scalar_prefetch=0,
            grid=(n_stats + n_apply,),
            in_specs=[
                # a1: advances during the stats phase, then parks on its last block.
                pl.BlockSpec((cin, tp1), lambda i: (0, jnp.minimum(i, n_stats - 1))),
                # a2 / r2 / out: parked on block 0 during stats, advance during apply.
                pl.BlockSpec((cin, tp2), lambda i: (0, jnp.maximum(i - n_stats, 0))),
                pl.BlockSpec((c_mid, tp2), lambda i: (0, jnp.maximum(i - n_stats, 0))),
                pl.BlockSpec((c_mid, cin), lambda i: (0, 0)),
                pl.BlockSpec((cout, c_mid), lambda i: (0, 0)),
                pl.BlockSpec((c_mid, 1), lambda i: (0, 0)),
                pl.BlockSpec((c_mid, 1), lambda i: (0, 0)),
            ],
            out_specs=pl.BlockSpec((cout, tp2),
                                   lambda i: (0, jnp.maximum(i - n_stats, 0))),
            scratch_shapes=[pltpu.VMEM((c_mid, 1), jnp.float32),
                            pltpu.VMEM((c_mid, 1), jnp.float32)]),
        compiler_params=pltpu.CompilerParams(
            dimension_semantics=("arbitrary",),   # stats must precede apply
            vmem_limit_bytes=VMEM_LIMIT),
    )(a1, a2, r2, w1m, w2m, g2, b2)

    # (cout, P2) -> NCHW is a free reshape (no de-pad copy).
    return out_flat.reshape(1, cout, h2, w2_sp)


def _reference(x3, x13, w1, gamma, beta, w2):
    """Pure-JAX f32 reference matching the torch module in training mode."""
    x = x3[:, :, ::2, ::2]
    y = jnp.einsum('nchw,oc->nohw', x, w1[:, :, 0, 0])
    mean = jnp.mean(y, axis=(0, 2, 3), keepdims=True)
    var = jnp.mean((y - mean) ** 2, axis=(0, 2, 3), keepdims=True)
    yb = (y - mean) * jax.lax.rsqrt(var + BN_EPS)
    yb = yb * gamma.reshape(1, -1, 1, 1) + beta.reshape(1, -1, 1, 1)
    z = jnp.maximum(yb + x13, 0.0)
    return jnp.einsum('nchw,oc->nohw', z[:, :, ::2, ::2], w2[:, :, 0, 0])


if __name__ == "__main__":
    key = jax.random.PRNGKey(0)
    k0, k1, k2, k3 = jax.random.split(key, 4)

    # Small spatial size; channel counts are fixed by the module (32 -> 64 -> 128).
    H, W = 16, 16
    x3 = jax.random.normal(k0, (1, 32, H, W), dtype=jnp.float32)
    x13 = jax.random.normal(k1, (1, 64, H // 2, W // 2), dtype=jnp.float32)

    # Deterministic synthetic parameters (torch conv weight layout [out,in,1,1]).
    w1 = 0.1 * jax.random.normal(k2, (64, 32, 1, 1), dtype=jnp.float32)
    w2 = 0.1 * jax.random.normal(k3, (128, 64, 1, 1), dtype=jnp.float32)
    gamma = jnp.ones((64,), dtype=jnp.float32)   # BN weight init
    beta = jnp.zeros((64,), dtype=jnp.float32)   # BN bias init

    out = model_forward(x3, x13, w1, gamma, beta, w2)
    jax.block_until_ready(out)
    assert out.shape == (1, 128, H // 4, W // 4), out.shape

    # Loose tolerance: matmuls + residual DMA intentionally run in bf16 (f32 accumulation).
    ref = _reference(x3, x13, w1, gamma, beta, w2)
    err = float(jnp.max(jnp.abs(out - ref)) / (jnp.max(jnp.abs(ref)) + 1e-6))
    assert err < 5e-2, f"normalized max error too large: {err}"

    print("KERNEL_OK")
</pallas_src>

<mosaic_0001>
module attributes {stable_mosaic.version = 11 : i64} {
  func.func @_fused_kernel(%arg0: i32, %arg1: memref<32x128xbf16, #tpu.memory_space<vmem>>, %arg2: memref<32x128xbf16, #tpu.memory_space<vmem>>, %arg3: memref<64x128xbf16, #tpu.memory_space<vmem>>, %arg4: memref<64x32xbf16, #tpu.memory_space<vmem>>, %arg5: memref<128x64xbf16, #tpu.memory_space<vmem>>, %arg6: memref<64x1xf32, #tpu.memory_space<vmem>>, %arg7: memref<64x1xf32, #tpu.memory_space<vmem>>, %arg8: memref<128x128xf32, #tpu.memory_space<vmem>>, %arg9: memref<64x1xf32, #tpu.memory_space<vmem>>, %arg10: memref<64x1xf32, #tpu.memory_space<vmem>>) attributes {dimension_semantics = [#tpu.dimension_semantics<arbitrary>], iteration_bounds = array<i64: 2>, scalar_prefetch = 0 : i64, scratch_operands = 2 : i64, tpu.core_type = #tpu.core_type<tc>, window_params = [{transform_indices = @transform_0, window_bounds = array<i64: 32, 128>}, {transform_indices = @transform_1, window_bounds = array<i64: 32, 128>}, {transform_indices = @transform_2, window_bounds = array<i64: 64, 128>}, {pipeline_mode = #tpu.pipeline_mode<synchronous>, transform_indices = @transform_3, window_bounds = array<i64: 64, 32>}, {pipeline_mode = #tpu.pipeline_mode<synchronous>, transform_indices = @transform_4, window_bounds = array<i64: 128, 64>}, {pipeline_mode = #tpu.pipeline_mode<synchronous>, transform_indices = @transform_5, window_bounds = array<i64: 64, 1>}, {pipeline_mode = #tpu.pipeline_mode<synchronous>, transform_indices = @transform_6, window_bounds = array<i64: 64, 1>}, {transform_indices = @transform_7, window_bounds = array<i64: 128, 128>}]} {
    %c0_i32 = arith.constant 0 : i32
    %0 = arith.cmpi eq, %arg0, %c0_i32 : i32
    %1 = arith.extui %0 : i1 to i32
    %c0_i32_0 = arith.constant 0 : i32
    %2 = arith.cmpi ne, %1, %c0_i32_0 : i32
    scf.if %2 {
      %cst = arith.constant 0.000000e+00 : f32
      %9 = vector.broadcast %cst : f32 to vector<64x1xf32>
      %c0 = arith.constant 0 : index
      %c0_4 = arith.constant 0 : index
      %10 = vector.load %arg9[%c0, %c0_4] : memref<64x1xf32, #tpu.memory_space<vmem>>, vector<64x1xf32>
      tpu.vector_store %arg9[%c0, %c0_4], %9 {strides = array<i32>} : memref<64x1xf32, #tpu.memory_space<vmem>>, vector<64x1xf32>,
      %cst_5 = arith.constant 0.000000e+00 : f32
      %11 = vector.broadcast %cst_5 : f32 to vector<64x1xf32>
      %c0_6 = arith.constant 0 : index
      %c0_7 = arith.constant 0 : index
      %12 = vector.load %arg10[%c0_6, %c0_7] : memref<64x1xf32, #tpu.memory_space<vmem>>, vector<64x1xf32>
      tpu.vector_store %arg10[%c0_6, %c0_7], %11 {strides = array<i32>} : memref<64x1xf32, #tpu.memory_space<vmem>>, vector<64x1xf32>,
    } else {
    }
    %c1_i32 = arith.constant 1 : i32
    %3 = arith.cmpi slt, %arg0, %c1_i32 : i32
    %4 = arith.extui %3 : i1 to i32
    %c0_i32_1 = arith.constant 0 : i32
    %5 = arith.cmpi ne, %4, %c0_i32_1 : i32
    scf.if %5 {
      %c0 = arith.constant 0 : index
      %c0_4 = arith.constant 0 : index
      %9 = vector.load %arg4[%c0, %c0_4] : memref<64x32xbf16, #tpu.memory_space<vmem>>, vector<64x32xbf16>
      %c0_5 = arith.constant 0 : index
      %c0_6 = arith.constant 0 : index
      %10 = vector.load %arg1[%c0_5, %c0_6] : memref<32x128xbf16, #tpu.memory_space<vmem>>, vector<32x128xbf16>
      %cst = arith.constant dense<0.000000e+00> : vector<64x128xf32>
      %11 = tpu.matmul %9, %10, %cst {dimension_numbers = #tpu.dot_dimension_numbers<[1], [0], [0], [1], [0, 0, 1, 1], [], []>} : vector<64x32xbf16>, vector<32x128xbf16>, vector<64x128xf32> -> vector<64x128xf32>
      %c128_i32 = arith.constant 128 : i32
      %12 = arith.muli %arg0, %c128_i32 : i32
      %c64_i32 = arith.constant 64 : i32
      %13 = arith.subi %c64_i32, %12 : i32
      %c128_i32_7 = arith.constant 128 : i32
      %14 = arith.minsi %13, %c128_i32_7 : i32
      %15 = tpu.iota {dimensions = array<i32: 1>} : vector<64x128xi32>
      %16 = vector.broadcast %14 : i32 to vector<64x128xi32>
      %17 = arith.cmpi slt, %15, %16 : vector<64x128xi32>
      %cst_8 = arith.constant 0.000000e+00 : f32
      %18 = vector.broadcast %cst_8 : f32 to vector<64x128xf32>
      %19 = arith.select %17, %11, %18 : vector<64x128xi1>, vector<64x128xf32>
      %c0_9 = arith.constant 0 : index
      %c0_10 = arith.constant 0 : index
      %20 = vector.load %arg9[%c0_9, %c0_10] : memref<64x1xf32, #tpu.memory_space<vmem>>, vector<64x1xf32>
      %cst_11 = arith.constant dense<0.000000e+00> : vector<64xf32>
      %21 = vector.multi_reduction <add>, %19, %cst_11 [1] : vector<64x128xf32> to vector<64xf32>
      %22 = vector.shape_cast %21 : vector<64xf32> to vector<64x1xf32>
      %23 = arith.addf %20, %22 : vector<64x1xf32>
      %c0_12 = arith.constant 0 : index
      %c0_13 = arith.constant 0 : index
      %24 = vector.load %arg9[%c0_12, %c0_13] : memref<64x1xf32, #tpu.memory_space<vmem>>, vector<64x1xf32>
      tpu.vector_store %arg9[%c0_12, %c0_13], %23 {strides = array<i32>} : memref<64x1xf32, #tpu.memory_space<vmem>>, vector<64x1xf32>,
      %c0_14 = arith.constant 0 : index
      %c0_15 = arith.constant 0 : index
      %25 = vector.load %arg10[%c0_14, %c0_15] : memref<64x1xf32, #tpu.memory_space<vmem>>, vector<64x1xf32>
      %26 = arith.mulf %19, %19 : vector<64x128xf32>
      %cst_16 = arith.constant dense<0.000000e+00> : vector<64xf32>
      %27 = vector.multi_reduction <add>, %26, %cst_16 [1] : vector<64x128xf32> to vector<64xf32>
      %28 = vector.shape_cast %27 : vector<64xf32> to vector<64x1xf32>
      %29 = arith.addf %25, %28 : vector<64x1xf32>
      %c0_17 = arith.constant 0 : index
      %c0_18 = arith.constant 0 : index
      %30 = vector.load %arg10[%c0_17, %c0_18] : memref<64x1xf32, #tpu.memory_space<vmem>>, vector<64x1xf32>
      tpu.vector_store %arg10[%c0_17, %c0_18], %29 {strides = array<i32>} : memref<64x1xf32, #tpu.memory_space<vmem>>, vector<64x1xf32>,
    } else {
    }
    %c1_i32_2 = arith.constant 1 : i32
    %6 = arith.cmpi sge, %arg0, %c1_i32_2 : i32
    %7 = arith.extui %6 : i1 to i32
    %c0_i32_3 = arith.constant 0 : i32
    %8 = arith.cmpi ne, %7, %c0_i32_3 : i32
    scf.if %8 {
      %c0 = arith.constant 0 : index
      %c0_4 = arith.constant 0 : index
      %9 = vector.load %arg9[%c0, %c0_4] : memref<64x1xf32, #tpu.memory_space<vmem>>, vector<64x1xf32>
      %cst = arith.constant 1.562500e-02 : f32
      %10 = vector.broadcast %cst : f32 to vector<64x1xf32>
      %11 = arith.mulf %9, %10 : vector<64x1xf32>
      %c0_5 = arith.constant 0 : index
      %c0_6 = arith.constant 0 : index
      %12 = vector.load %arg10[%c0_5, %c0_6] : memref<64x1xf32, #tpu.memory_space<vmem>>, vector<64x1xf32>
      %cst_7 = arith.constant 1.562500e-02 : f32
      %13 = vector.broadcast %cst_7 : f32 to vector<64x1xf32>
      %14 = arith.mulf %12, %13 : vector<64x1xf32>
      %15 = arith.mulf %11, %11 : vector<64x1xf32>
      %16 = arith.subf %14, %15 : vector<64x1xf32>
      %c0_8 = arith.constant 0 : index
      %c0_9 = arith.constant 0 : index
      %17 = vector.load %arg6[%c0_8, %c0_9] : memref<64x1xf32, #tpu.memory_space<vmem>>, vector<64x1xf32>
      %cst_10 = arith.constant 9.99999974E-6 : f32
      %18 = vector.broadcast %cst_10 : f32 to vector<64x1xf32>
      %19 = arith.addf %16, %18 : vector<64x1xf32>
      %20 = math.rsqrt %19 : vector<64x1xf32>
      %21 = arith.mulf %17, %20 : vector<64x1xf32>
      %c0_11 = arith.constant 0 : index
      %c0_12 = arith.constant 0 : index
      %22 = vector.load %arg7[%c0_11, %c0_12] : memref<64x1xf32, #tpu.memory_space<vmem>>, vector<64x1xf32>
      %23 = arith.mulf %11, %21 : vector<64x1xf32>
      %24 = arith.subf %22, %23 : vector<64x1xf32>
      %c0_13 = arith.constant 0 : index
      %c0_14 = arith.constant 0 : index
      %25 = vector.load %arg4[%c0_13, %c0_14] : memref<64x32xbf16, #tpu.memory_space<vmem>>, vector<64x32xbf16>
      %c0_15 = arith.constant 0 : index
      %c0_16 = arith.constant 0 : index
      %26 = vector.load %arg2[%c0_15, %c0_16] : memref<32x128xbf16, #tpu.memory_space<vmem>>, vector<32x128xbf16>
      %cst_17 = arith.constant dense<0.000000e+00> : vector<64x128xf32>
      %27 = tpu.matmul %25, %26, %cst_17 {dimension_numbers = #tpu.dot_dimension_numbers<[1], [0], [0], [1], [0, 0, 1, 1], [], []>} : vector<64x32xbf16>, vector<32x128xbf16>, vector<64x128xf32> -> vector<64x128xf32>
      %28 = vector.broadcast %21 : vector<64x1xf32> to vector<64x128xf32>
      %29 = arith.mulf %27, %28 : vector<64x128xf32>
      %30 = vector.broadcast %24 : vector<64x1xf32> to vector<64x128xf32>
      %31 = arith.addf %29, %30 : vector<64x128xf32>
      %c0_18 = arith.constant 0 : index
      %c0_19 = arith.constant 0 : index
      %32 = vector.load %arg3[%c0_18, %c0_19] : memref<64x128xbf16, #tpu.memory_space<vmem>>, vector<64x128xbf16>
      %33 = arith.extf %32 : vector<64x128xbf16> to vector<64x128xf32>
      %34 = arith.addf %31, %33 : vector<64x128xf32>
      %cst_20 = arith.constant 0.000000e+00 : f32
      %35 = vector.broadcast %cst_20 : f32 to vector<64x128xf32>
      %36 = arith.maximumf %34, %35 : vector<64x128xf32>
      %c0_21 = arith.constant 0 : index
      %c0_22 = arith.constant 0 : index
      %37 = vector.load %arg5[%c0_21, %c0_22] : memref<128x64xbf16, #tpu.memory_space<vmem>>, vector<128x64xbf16>
      %38 = arith.truncf %36 : vector<64x128xf32> to vector<64x128xbf16>
      %cst_23 = arith.constant dense<0.000000e+00> : vector<128x128xf32>
      %39 = tpu.matmul %37, %38, %cst_23 {dimension_numbers = #tpu.dot_dimension_numbers<[1], [0], [0], [1], [0, 0, 1, 1], [], []>} : vector<128x64xbf16>, vector<64x128xbf16>, vector<128x128xf32> -> vector<128x128xf32>
      %c0_24 = arith.constant 0 : index
      %c0_25 = arith.constant 0 : index
      %40 = vector.load %arg8[%c0_24, %c0_25] : memref<128x128xf32, #tpu.memory_space<vmem>>, vector<128x128xf32>
      tpu.vector_store %arg8[%c0_24, %c0_25], %39 {strides = array<i32>} : memref<128x128xf32, #tpu.memory_space<vmem>>, vector<128x128xf32>,
    } else {
    }
    return
  }
  func.func @transform_0(%arg0: i32) -> (i32, i32) {
    %c0_i32 = arith.constant 0 : i32
    %0 = arith.minsi %arg0, %c0_i32 : i32
    %c0_i32_0 = arith.constant 0 : i32
    %c0_i32_1 = arith.constant 0 : i32
    return %c0_i32_0, %0 : i32, i32
  }
  func.func @transform_1(%arg0: i32) -> (i32, i32) {
    %c1_i32 = arith.constant 1 : i32
    %0 = arith.subi %arg0, %c1_i32 : i32
    %c0_i32 = arith.constant 0 : i32
    %1 = arith.maxsi %0, %c0_i32 : i32
    %c0_i32_0 = arith.constant 0 : i32
    %c0_i32_1 = arith.constant 0 : i32
    return %c0_i32_0, %1 : i32, i32
  }
  func.func @transform_2(%arg0: i32) -> (i32, i32) {
    %c1_i32 = arith.constant 1 : i32
    %0 = arith.subi %arg0, %c1_i32 : i32
    %c0_i32 = arith.constant 0 : i32
    %1 = arith.maxsi %0, %c0_i32 : i32
    %c0_i32_0 = arith.constant 0 : i32
    %c0_i32_1 = arith.constant 0 : i32
    return %c0_i32_0, %1 : i32, i32
  }
  func.func @transform_3(%arg0: i32) -> (i32, i32) {
    %c0_i32 = arith.constant 0 : i32
    %c0_i32_0 = arith.constant 0 : i32
    %c0_i32_1 = arith.constant 0 : i32
    return %c0_i32, %c0_i32_0 : i32, i32
  }
  func.func @transform_4(%arg0: i32) -> (i32, i32) {
    %c0_i32 = arith.constant 0 : i32
    %c0_i32_0 = arith.constant 0 : i32
    %c0_i32_1 = arith.constant 0 : i32
    return %c0_i32, %c0_i32_0 : i32, i32
  }
  func.func @transform_5(%arg0: i32) -> (i32, i32) {
    %c0_i32 = arith.constant 0 : i32
    %c0_i32_0 = arith.constant 0 : i32
    %c0_i32_1 = arith.constant 0 : i32
    return %c0_i32, %c0_i32_0 : i32, i32
  }
  func.func @transform_6(%arg0: i32) -> (i32, i32) {
    %c0_i32 = arith.constant 0 : i32
    %c0_i32_0 = arith.constant 0 : i32
    %c0_i32_1 = arith.constant 0 : i32
    return %c0_i32, %c0_i32_0 : i32, i32
  }
  func.func @transform_7(%arg0: i32) -> (i32, i32) {
    %c1_i32 = arith.constant 1 : i32
    %0 = arith.subi %arg0, %c1_i32 : i32
    %c0_i32 = arith.constant 0 : i32
    %1 = arith.maxsi %0, %c0_i32 : i32
    %c0_i32_0 = arith.constant 0 : i32
    %c0_i32_1 = arith.constant 0 : i32
    return %c0_i32_0, %1 : i32, i32
  }
}

</mosaic_0001>

<bundles_post_ra>
// kernel: model_forward.1
= control target key start
LH: loop header
LB: loop body
LE: loop exit
PB: predicated region body
PF: predicated region fallthrough
CT: control target
= control target key end

     0   :  { %s1553_s24 = smov 0   ;;  %s1841_s0 = inlined_call_operand.vmem [shape: bf16[32,64], index: 0, kind: input, shape index: {}]   ;;  %s1842_s1 = inlined_call_operand.vmem [shape: bf16[32,16], index: 1, kind: input, shape index: {}]   ;;  %s1843_s2 = inlined_call_operand.vmem [shape: bf16[64,16], index: 2, kind: input, shape index: {}]   ;;  %s1844_s3 = inlined_call_operand.vmem [shape: bf16[64,32], index: 3, kind: input, shape index: {}]   ;;  %s1845_s4 = inlined_call_operand.vmem [shape: bf16[128,64], index: 4, kind: input, shape index: {}]   ;;  %s1846_s5 = inlined_call_operand.vmem [shape: f32[64,1], index: 5, kind: input, shape index: {}]   ;;  %s1847_s6 = inlined_call_operand.vmem [shape: f32[64,1], index: 6, kind: input, shape index: {}]   ;;  %s1848_s7 = inlined_call_operand.vmem [shape: f32[128,16], index: 7, kind: output, shape index: {}]  }
   0x1 LB: > { %s1559_s25 = sadd.s32 4294967295, %s1509_s24   ;;  %p1284_p0 = scmp.ge.s32.totalorder %s1509_s24, 1  ;;  %s1509_s24 = sphi %s1553_s24, %s17_s24  }
   0x2   : > { %p292_p1 = scmp.lt.s32.totalorder %s1509_s24, 3 }
   0x4   : > { %p293_p2 = pnand %p1284_p0, %p292_p1 }
   0x5   : > { %p341_p3 = scmp.lt.s32.totalorder (!%p293_p2), %s1559_s25, 0  ;;  %p1310_p4 = scmp.ne.s32.totalorder (!%p293_p2), %s1559_s25, 0 }
   0x6   : > { %296 = sbr.rel (%p293_p2) target bundleno = 902 (0x386), region = 48 }
   0xd   : > { %s342_s26 = scalar_select %p341_p3, %s1559_s25, 0 }
   0xe   : > { %383 = sbr.rel (%p1310_p4) target bundleno = 23 (0x17), region = 52  ;;  %vm384_vm0 = vcmask (!%p1310_p4), 7168   ;;  %v1511_v0 = vmov (!%p1310_p4), 0.0  }
   0xf   : > { %s1852_s26 = smov (!%p341_p3, %s342_s26), 0  ;;  %385 = vst.msk [vmem:[#allocation2] sm:$0xff] (!%p1310_p4), %vm384_vm0, %v1511_v0  ;;  %386 = vst.msk [vmem:[#allocation2 + $0x8] sm:$0xff] (!%p1310_p4), %vm384_vm0, %v1511_v0 }
  0x10   : > { %s1288_s27 = sshll.u32 %s1852_s26, 2  ;;  %387 = vst.msk [vmem:[#allocation2 + $0x10] sm:$0xff] (!%p1310_p4), %vm384_vm0, %v1511_v0  ;;  %388 = vst.msk [vmem:[#allocation2 + $0x18] sm:$0xff] (!%p1310_p4), %vm384_vm0, %v1511_v0 }
  0x11   : > { %s346_s30 = scalar_lea.vmem %s1841_s0, %s1288_s27  ;;  %389 = vst.msk [vmem:[#allocation2 + $0x20] sm:$0xff] (!%p1310_p4), %vm384_vm0, %v1511_v0  ;;  %390 = vst.msk [vmem:[#allocation2 + $0x28] sm:$0xff] (!%p1310_p4), %vm384_vm0, %v1511_v0 }
  0x12   : > { %391 = vst.msk [vmem:[#allocation2 + $0x30] sm:$0xff] (!%p1310_p4), %vm384_vm0, %v1511_v0  ;;  %392 = vst.msk [vmem:[#allocation2 + $0x38] sm:$0xff] (!%p1310_p4), %vm384_vm0, %v1511_v0 }
  0x13   : > { %393 = vst.msk [vmem:[#allocation3] sm:$0xff] (!%p1310_p4), %vm384_vm0, %v1511_v0  ;;  %394 = vst.msk [vmem:[#allocation3 + $0x8] sm:$0xff] (!%p1310_p4), %vm384_vm0, %v1511_v0 }
  0x14   : > { %395 = vst.msk [vmem:[#allocation3 + $0x10] sm:$0xff] (!%p1310_p4), %vm384_vm0, %v1511_v0  ;;  %396 = vst.msk [vmem:[#allocation3 + $0x18] sm:$0xff] (!%p1310_p4), %vm384_vm0, %v1511_v0 }
  0x15   : > { %397 = vst.msk [vmem:[#allocation3 + $0x20] sm:$0xff] %vm384_vm0, %v1511_v0  ;;  %398 = vst.msk [vmem:[#allocation3 + $0x28] sm:$0xff] %vm384_vm0, %v1511_v0 }
  0x16   : > { %399 = vst.msk [vmem:[#allocation3 + $0x30] sm:$0xff] %vm384_vm0, %v1511_v0  ;;  %400 = vst.msk [vmem:[#allocation3 + $0x38] sm:$0xff] %vm384_vm0, %v1511_v0 }
  0x17 PF: > { %p1311_p5 = scmp.ge.s32.totalorder %s1559_s25, 1 }
  0x18   : > { %v1465_v1 = vld [vmem:[%s346_s30] sm:$0xff] (!%p1311_p5)   ;;  %v1466_v2 = vld [vmem:[%s346_s30 + $0x8] sm:$0xff] (!%p1311_p5)   ;;  %vm449_vm1 = vcmask (!%p1311_p5), 261120   ;;  %v1468_v4 = vld [vmem:[%s1844_s3 + $0x10] sm:$0xff] (!%p1311_p5)   ;;  %s1322_s16 = sshll.u32 (!%p1311_p5), %s1559_s25, 7  ;;  %v531_v7 = vlaneseq (!%p1311_p5)  ;;  %vm575_vm3 = vcmask (!%p1311_p5), 7168  }
  0x19   : > { %404 = sbr.rel (%p1311_p5) target bundleno = 419 (0x1a3), region = 56  ;;  %1395 = vmatprep.subr.bf16.mxu0 (!%p1311_p5), %v1465_v1  ;;  %1443 = vmatprep.subr.bf16.mxu1 (!%p1311_p5), %v1465_v1  ;;  %v1467_v3 = vld [vmem:[%s1844_s3] sm:$0xff] (!%p1311_p5)   ;;  %v1469_v5 = vld [vmem:[%s1844_s3 + $0x8] sm:$0xff] (!%p1311_p5)   ;;  %v1470_v6 = vld [vmem:[%s1844_s3 + $0x18] sm:$0xff] (!%p1311_p5)   ;;  %s528_s17 = ssub.s32 (!%p1311_p5), 64, %s1322_s16 }
  0x1a   : > { %1396 = vmatpush3.bf16.msra.mxu0 (!%p1311_p5), %v1465_v1  ;;  %1445 = vmatpush3.bf16.msra.mxu1 (!%p1311_p5), %v1465_v1  ;;  %p529_p6 = scmp.lt.s32.totalorder (!%p1311_p5), %s528_s17, 128  ;;  %v532_v8 = vand.u32 (!%p1311_p5), 127, %v531_v7  ;;  %v545_v36 = vld [vmem:[#allocation2 + $0x10] sm:$0xff] (!%p1311_p5)  ;;  %v543_v41 = vld [vmem:[#allocation2] sm:$0xff] (!%p1311_p5)  ;;  %v546_v42 = vld [vmem:[#allocation2 + $0x18] sm:$0xff] (!%p1311_p5) }
  0x1b   : > { %1397 = vmatprep.subr.bf16.mxu0 (!%p1311_p5), %v1466_v2  ;;  %1444 = vmatprep.subr.bf16.mxu1 (!%p1311_p5), %v1466_v2  ;;  %v549_v35 = vld [vmem:[#allocation2 + $0x30] sm:$0xff] (!%p1311_p5)  ;;  %v547_v47 = vld [vmem:[#allocation2 + $0x20] sm:$0xff] (!%p1311_p5)  ;;  %v550_v48 = vld [vmem:[#allocation2 + $0x38] sm:$0xff] (!%p1311_p5) }
  0x1c   : > { %1399 = vmatprep.mubr.msk.bf16.mxu0 (!%p1311_p5), %vm449_vm1, %v1467_v3  ;;  %1403 = vmatprep.mubr.msk.bf16.mxu1 (!%p1311_p5), %vm449_vm1, %v1468_v4  ;;  %v548_v54 = vld [vmem:[#allocation2 + $0x28] sm:$0xff] (!%p1311_p5)  ;;  %v584_v1 = vld [vmem:[#allocation3] sm:$0xff] (!%p1311_p5) }
  0x1d   : > { %v586_v53 = vld [vmem:[#allocation3 + $0x10] sm:$0xff] (!%p1311_p5)  ;;  %v587_v59 = vld [vmem:[#allocation3 + $0x18] sm:$0xff] (!%p1311_p5)  ;;  %v544_v60 = vld [vmem:[#allocation2 + $0x8] sm:$0xff] (!%p1311_p5) }
  0x1e   : > { %1398 = vmatpush3.bf16.msra.mxu0 (!%p1311_p5), %v1466_v2  ;;  %1446 = vmatpush3.bf16.msra.mxu1 (!%p1311_p5), %v1466_v2  ;;  %v585_v2 = vld [vmem:[#allocation3 + $0x8] sm:$0xff] (!%p1311_p5)  ;;  %v588_v7 = vld [vmem:[#allocation3 + $0x20] sm:$0xff] (!%p1311_p5) }
  0x20   : > { %s1854_s17 = smov (!%p529_p6, %s528_s17), 128 }
  0x21   : > { %1400 = vmatmul.mubr.msk.bf16.vlgmr.msra.gmra.mrb[0].mxu0 %vm449_vm1, %v1469_v5  ;;  %1404 = vmatmul.mubr.msk.bf16.vlgmr.msra.gmra.mrb[0].mxu1 %vm449_vm1, %v1470_v6  ;;  %v533_v9 = vstv %s1854_s17 }
  0x22   : > { %vm1599_vm2 = vcmp.lt.s32.totalorder %v532_v8, %v533_v9  ;;  %v589_v8 = vld [vmem:[#allocation3 + $0x28] sm:$0xff] }
  0xf4   : > { %v1401_v11 = vpop.f32.mrb[0].mxu0  ;;  %v1405_v12 = vpop.f32.mrb[0].mxu1 }
  0xf5   : > { %v496_v13 = vpop.f32.mrb[1].mxu0  ;;  %v512_v14 = vpop.f32.mrb[1].mxu1  ;;  %v541_v15 = vsel %vm1599_vm2, %v1405_v12, 0.0  ;;  %v537_v16 = vsel %vm1599_vm2, %v1401_v11, 0.0 }
  0xf6   : > { %563 = vadd.xlane.f32.xlu0 %v541_v15  ;;  %v1406_v17 = vpop.f32.mrb[2].mxu1  ;;  %555 = vadd.xlane.f32.xlu1 %v537_v16  ;;  %v1402_v18 = vpop.f32.mrb[2].mxu0  ;;  %v535_v21 = vsel %vm1599_vm2, %v496_v13, 0.0  ;;  %v539_v23 = vsel %vm1599_vm2, %v512_v14, 0.0  ;;  %v594_v25 = vmul.f32 %v537_v16, %v537_v16  ;;  %v598_v33 = vmul.f32 %v541_v15, %v541_v15  ;;  %v590_v13 = vld [vmem:[#allocation3 + $0x30] sm:$0xff]  ;;  %v591_v14 = vld [vmem:[#allocation3 + $0x38] sm:$0xff] }
  0xf7   : > { %v499_v19 = vpop.f32.mrb[3].mxu0  ;;  %v515_v20 = vpop.f32.mrb[3].mxu1  ;;  %v538_v22 = vsel %vm1599_vm2, %v1402_v18, 0.0  ;;  %v542_v24 = vsel %vm1599_vm2, %v1406_v17, 0.0  ;;  %v592_v29 = vmul.f32 %v535_v21, %v535_v21  ;;  %v596_v31 = vmul.f32 %v539_v23, %v539_v23 }
  0xf8   : > { %v540_v26 = vsel %vm1599_vm2, %v515_v20, 0.0  ;;  %v595_v27 = vmul.f32 %v538_v22, %v538_v22  ;;  %v536_v28 = vsel %vm1599_vm2, %v499_v19, 0.0  ;;  %v599_v34 = vmul.f32 %v542_v24, %v542_v24 }
  0xf9   : > { %v593_v30 = vmul.f32 %v536_v28, %v536_v28  ;;  %v597_v32 = vmul.f32 %v540_v26, %v540_v26 }
  0xfa   : > { %551 = vadd.xlane.f32.xlu0 %v535_v21  ;;  %557 = vadd.xlane.f32.xlu1 %v538_v22 }
  0xfe   : > { %559 = vadd.xlane.f32.xlu0 %v539_v23  ;;  %565 = vadd.xlane.f32.xlu1 %v542_v24 }
 0x102   : > { %604 = vadd.xlane.f32.xlu0 %v594_v25  ;;  %561 = vadd.xlane.f32.xlu1 %v540_v26 }
 0x106   : > { %606 = vadd.xlane.f32.xlu1 %v595_v27  ;;  %553 = vadd.xlane.f32.xlu0 %v536_v28 }
 0x10a   : > { %600 = vadd.xlane.f32.xlu0 %v592_v29  ;;  %602 = vadd.xlane.f32.xlu1 %v593_v30 }
 0x10e   : > { %608 = vadd.xlane.f32.xlu0 %v596_v31  ;;  %610 = vadd.xlane.f32.xlu1 %v597_v32 }
 0x112   : > { %612 = vadd.xlane.f32.xlu0 %v598_v33  ;;  %614 = vadd.xlane.f32.xlu1 %v599_v34 }
 0x183   : > { %v564_v37 = vpop.xlane.xlu0 %563  ;;  %v556_v38 = vpop.xlane.xlu1 %555 }
 0x184   : > { %v573_v39 = vadd.f32 %v564_v37, %v549_v35  ;;  %v569_v40 = vadd.f32 %v556_v38, %v545_v36 }
 0x186   : > { %582 = vst.msk [vmem:[#allocation2 + $0x30] sm:$0xff] %vm575_vm3, %v573_v39  ;;  %578 = vst.msk [vmem:[#allocation2 + $0x10] sm:$0xff] %vm575_vm3, %v569_v40 }
 0x187   : > { %v552_v43 = vpop.xlane.xlu0 %551  ;;  %v558_v44 = vpop.xlane.xlu1 %557 }
 0x188   : > { %v567_v45 = vadd.f32 %v552_v43, %v543_v41  ;;  %v570_v46 = vadd.f32 %v558_v44, %v546_v42 }
 0x18a   : > { %576 = vst.msk [vmem:[#allocation2] sm:$0xff] %vm575_vm3, %v567_v45  ;;  %579 = vst.msk [vmem:[#allocation2 + $0x18] sm:$0xff] %vm575_vm3, %v570_v46 }
 0x18b   : > { %v560_v49 = vpop.xlane.xlu0 %559  ;;  %v566_v50 = vpop.xlane.xlu1 %565 }
 0x18c   : > { %v571_v51 = vadd.f32 %v560_v49, %v547_v47  ;;  %v574_v52 = vadd.f32 %v566_v50, %v550_v48 }
 0x18e   : > { %580 = vst.msk [vmem:[#allocation2 + $0x20] sm:$0xff] %vm575_vm3, %v571_v51  ;;  %583 = vst.msk [vmem:[#allocation2 + $0x38] sm:$0xff] %vm575_vm3, %v574_v52 }
 0x18f   : > { %v605_v55 = vpop.xlane.xlu0 %604  ;;  %v562_v56 = vpop.xlane.xlu1 %561 }
 0x190   : > { %v618_v57 = vadd.f32 %v605_v55, %v586_v53  ;;  %v572_v58 = vadd.f32 %v562_v56, %v548_v54 }
 0x192   : > { %626 = vst.msk [vmem:[#allocation3 + $0x10] sm:$0xff] %vm575_vm3, %v618_v57  ;;  %581 = vst.msk [vmem:[#allocation2 + $0x28] sm:$0xff] %vm575_vm3, %v572_v58 }
 0x193   : > { %v607_v61 = vpop.xlane.xlu1 %606  ;;  %v554_v62 = vpop.xlane.xlu0 %553 }
 0x194   : > { %v619_v63 = vadd.f32 %v607_v61, %v587_v59  ;;  %v568_v0 = vadd.f32 %v554_v62, %v544_v60 }
 0x196   : > { %627 = vst.msk [vmem:[#allocation3 + $0x18] sm:$0xff] %vm575_vm3, %v619_v63  ;;  %577 = vst.msk [vmem:[#allocation2 + $0x8] sm:$0xff] %vm575_vm3, %v568_v0 }
 0x197   : > { %v601_v3 = vpop.xlane.xlu0 %600  ;;  %v603_v4 = vpop.xlane.xlu1 %602 }
 0x198   : > { %v616_v5 = vadd.f32 %v601_v3, %v584_v1  ;;  %v617_v6 = vadd.f32 %v603_v4, %v585_v2 }
 0x19a   : > { %624 = vst.msk [vmem:[#allocation3] sm:$0xff] %vm575_vm3, %v616_v5  ;;  %625 = vst.msk [vmem:[#allocation3 + $0x8] sm:$0xff] %vm575_vm3, %v617_v6 }
 0x19b   : > { %v609_v9 = vpop.xlane.xlu0 %608  ;;  %v611_v10 = vpop.xlane.xlu1 %610 }
 0x19c   : > { %v620_v11 = vadd.f32 %v609_v9, %v588_v7  ;;  %v621_v12 = vadd.f32 %v611_v10, %v589_v8 }
 0x19e   : > { %628 = vst.msk [vmem:[#allocation3 + $0x20] sm:$0xff] %vm575_vm3, %v620_v11  ;;  %629 = vst.msk [vmem:[#allocation3 + $0x28] sm:$0xff] %vm575_vm3, %v621_v12 }
 0x19f   : > { %v613_v15 = vpop.xlane.xlu0 %612  ;;  %v615_v16 = vpop.xlane.xlu1 %614 }
 0x1a0   : > { %v622_v17 = vadd.f32 %v613_v15, %v590_v13  ;;  %v623_v18 = vadd.f32 %v615_v16, %v591_v14 }
 0x1a2   : > { %630 = vst.msk [vmem:[#allocation3 + $0x30] sm:$0xff] %vm575_vm3, %v622_v17  ;;  %631 = vst.msk [vmem:[#allocation3 + $0x38] sm:$0xff] %vm575_vm3, %v623_v18 }
 0x1a3 PF: > { %p1323_p7 = scmp.lt.s32.totalorder %s1559_s25, 1 }
 0x1a4   : > { %v1473_v19 = vld [vmem:[%s1842_s1] sm:$0xff] (!%p1323_p7)   ;;  %vm784_vm4 = vcmask (!%p1323_p7), 261120   ;;  %v1474_v20 = vld [vmem:[%s1842_s1 + $0x8] sm:$0xff] (!%p1323_p7)   ;;  %v1512_v22 = vmov (!%p1323_p7), 0   ;;  %v639_v24 = vld [vmem:[#allocation2 + $0x18] sm:$0xff] (!%p1323_p7)  ;;  %vm1050_vm5 = vcmask (!%p1323_p7), 523264  }
 0x1a5   : > { %635 = sbr.rel (%p1323_p7) target bundleno = 902 (0x386), region = 60  ;;  %1407 = vmatprep.subr.bf16.mxu0 (!%p1323_p7), %v1473_v19  ;;  %v1475_v21 = vld [vmem:[%s1844_s3] sm:$0xff] (!%p1323_p7)   ;;  %1472 = vset.pattern.permute.xlu1 (!%p1323_p7), %v1512_v22  ;;  %v1476_v23 = vld [vmem:[%s1844_s3 + $0x8] sm:$0xff] (!%p1323_p7)   ;;  %v655_v25 = vld [vmem:[#allocation3 + $0x18] sm:$0xff] (!%p1323_p7)  ;;  %v1652_v27 = vmul.f32 (!%p1323_p7), 0.015625, %v639_v24 }
 0x1a6   : > { %1408 = vmatpush3.bf16.msra.mxu0 (!%p1323_p7), %v1473_v19  ;;  %1471 = vset.pattern.permute.xlu0 (!%p1323_p7), %v1512_v22  ;;  %v1477_v26 = vld [vmem:[%s1844_s3 + $0x10] sm:$0xff] (!%p1323_p7)   ;;  %v663_v28 = vmul.f32 (!%p1323_p7), 0.015625, %v655_v25  ;;  %v636_v29 = vld [vmem:[#allocation2] sm:$0xff] (!%p1323_p7)  ;;  %v641_v33 = vld [vmem:[#allocation2 + $0x28] sm:$0xff] (!%p1323_p7) }
 0x1a7   : > { %1409 = vmatprep.subr.bf16.mxu0 (!%p1323_p7), %v1474_v20  ;;  %1411 = vmatprep.mubr.msk.bf16.mxu0 (!%p1323_p7), %vm784_vm4, %v1475_v21  ;;  %v652_v30 = vld [vmem:[#allocation3] sm:$0xff] (!%p1323_p7)  ;;  %v1654_v31 = vmul.f32 (!%p1323_p7), 0.015625, %v636_v29  ;;  %v657_v34 = vld [vmem:[#allocation3 + $0x28] sm:$0xff] (!%p1323_p7)  ;;  %v671_v35 = vmul.f32 (!%p1323_p7), %v1652_v27, %v1652_v27  ;;  %v1658_v36 = vmul.f32 (!%p1323_p7), 0.015625, %v641_v33  ;;  %v643_v43 = vld [vmem:[#allocation2 + $0x38] sm:$0xff] (!%p1323_p7) }
 0x1a8   : > { %v660_v32 = vmul.f32 (!%p1323_p7), 0.015625, %v652_v30  ;;  %v665_v37 = vmul.f32 (!%p1323_p7), 0.015625, %v657_v34  ;;  %v637_v38 = vld [vmem:[#allocation2 + $0x8] sm:$0xff] (!%p1323_p7)  ;;  %v1668_v47 = vmul.f32 (!%p1323_p7), 0.015625, %v643_v43  ;;  %v638_v49 = vld [vmem:[#allocation2 + $0x10] sm:$0xff] (!%p1323_p7)  ;;  %v640_v55 = vld [vmem:[#allocation2 + $0x20] sm:$0xff] (!%p1323_p7) }
 0x1a9   : > { %v653_v39 = vld [vmem:[#allocation3 + $0x8] sm:$0xff] (!%p1323_p7)  ;;  %v668_v40 = vmul.f32 (!%p1323_p7), %v1654_v31, %v1654_v31  ;;  %v1663_v41 = vmul.f32 (!%p1323_p7), 0.015625, %v637_v38  ;;  %v659_v44 = vld [vmem:[#allocation3 + $0x38] sm:$0xff] (!%p1323_p7)  ;;  %v679_v45 = vsub.f32 (!%p1323_p7), %v663_v28, %v671_v35  ;;  %v673_v46 = vmul.f32 (!%p1323_p7), %v1658_v36, %v1658_v36  ;;  %v654_v50 = vld [vmem:[#allocation3 + $0x10] sm:$0xff] (!%p1323_p7) }
 0x1aa   : > { %1410 = vmatpush3.bf16.msra.mxu0 (!%p1323_p7), %v1474_v20  ;;  %v661_v42 = vmul.f32 (!%p1323_p7), 0.015625, %v653_v39  ;;  %v667_v48 = vmul.f32 (!%p1323_p7), 0.015625, %v659_v44  ;;  %v1672_v53 = vmul.f32 (!%p1323_p7), 0.015625, %v638_v49  ;;  %v662_v54 = vmul.f32 (!%p1323_p7), 0.015625, %v654_v50  ;;  %v656_v56 = vld [vmem:[#allocation3 + $0x20] sm:$0xff] (!%p1323_p7)  ;;  %v642_v61 = vld [vmem:[#allocation2 + $0x30] sm:$0xff] (!%p1323_p7) }
 0x1ab   : > { %v676_v51 = vsub.f32 (!%p1323_p7), %v660_v32, %v668_v40  ;;  %v669_v52 = vmul.f32 (!%p1323_p7), %v1663_v41, %v1663_v41  ;;  %v695_v57 = vadd.f32 (!%p1323_p7), 1e-05, %v679_v45  ;;  %v681_v58 = vsub.f32 (!%p1323_p7), %v665_v37, %v673_v46  ;;  %v1478_v62 = vld [vmem:[%s1844_s3 + $0x18] sm:$0xff] (!%p1323_p7)   ;;  %v658_v3 = vld [vmem:[#allocation3 + $0x30] sm:$0xff] (!%p1323_p7)  ;;  %v684_v18 = vld [vmem:[%s1846_s5] sm:$0xff] (!%p1323_p7) }
 0x1ac   : > { %v675_v59 = vmul.f32 %v1668_v47, %v1668_v47  ;;  %v1676_v60 = vmul.f32 0.015625, %v640_v55  ;;  %v670_v1 = vmul.f32 %v1672_v53, %v1672_v53  ;;  %v664_v2 = vmul.f32 0.015625, %v656_v56  ;;  %v687_v17 = vld [vmem:[%s1846_s5 + $0x18] sm:$0xff]  ;;  %v689_v21 = vld [vmem:[%s1846_s5 + $0x28] sm:$0xff]  ;;  %v686_v35 = vld [vmem:[%s1846_s5 + $0x10] sm:$0xff] }
 0x1ad   : > { %1412 = vmatmul.mubr.msk.bf16.vlgmr.msra.gmra.mrb[0].mxu0 %vm784_vm4, %v1476_v23  ;;  %v692_v63 = vadd.f32 1e-05, %v676_v51  ;;  %v677_v0 = vsub.f32 %v661_v42, %v669_v52  ;;  %1487 = vrsqrt.f32 %v695_v57  ;;  %v697_v4 = vadd.f32 1e-05, %v681_v58  ;;  %v685_v24 = vld [vmem:[%s1846_s5 + $0x8] sm:$0xff]  ;;  %v691_v33 = vld [vmem:[%s1846_s5 + $0x38] sm:$0xff] }
 0x1ae   : > { %1415 = vmatprep.mubr.msk.bf16.mxu0 %vm784_vm4, %v1477_v26  ;;  %v683_v5 = vsub.f32 %v667_v48, %v675_v59  ;;  %v672_v6 = vmul.f32 %v1676_v60, %v1676_v60  ;;  %v678_v8 = vsub.f32 %v662_v54, %v670_v1  ;;  %v1685_v9 = vmul.f32 0.015625, %v642_v61  ;;  %v716_v40 = vld [vmem:[%s1847_s6] sm:$0xff]  ;;  %v690_v49 = vld [vmem:[%s1846_s5 + $0x30] sm:$0xff] }
 0x1af   : > { %1489 = vrsqrt.f32 %v692_v63  ;;  %v693_v7 = vadd.f32 1e-05, %v677_v0  ;;  %v666_v12 = vmul.f32 0.015625, %v658_v3  ;;  %v688_v43 = vld [vmem:[%s1846_s5 + $0x20] sm:$0xff]  ;;  %v718_v55 = vld [vmem:[%s1847_s6 + $0x10] sm:$0xff] }
 0x1b0   : > { %1491 = vrsqrt.f32 %v697_v4  ;;  %v699_v10 = vadd.f32 1e-05, %v683_v5  ;;  %v680_v11 = vsub.f32 %v664_v2, %v672_v6  ;;  %v694_v13 = vadd.f32 1e-05, %v678_v8  ;;  %v720_v59 = vld [vmem:[%s1847_s6 + $0x20] sm:$0xff]  ;;  %v722_v0 = vld [vmem:[%s1847_s6 + $0x30] sm:$0xff] }
 0x1b1   : > { %1493 = vrsqrt.f32 %v693_v7  ;;  %v674_v14 = vmul.f32 %v1685_v9, %v1685_v9  ;;  %v1483_v3 = vld [vmem:[%s1845_s4] sm:$0xff]  }
 0x1b2   : > { %1495 = vrsqrt.f32 %v699_v10  ;;  %v696_v15 = vadd.f32 1e-05, %v680_v11 }
 0x1b3   : > { %1497 = vrsqrt.f32 %v694_v13  ;;  %v682_v16 = vsub.f32 %v666_v12, %v674_v14 }
 0x1b4   : > { %1499 = vrsqrt.f32 %v696_v15  ;;  %v1368_v15 = vld [vmem:[%s1843_s2 + $0x8] sm:$0xff]  }
 0x1b5   : > { %1416 = vmatmul.mubr.msk.bf16.gmra.mrb[4].mxu0 %vm784_vm4, %v1478_v62  ;;  %v698_v19 = vadd.f32 1e-05, %v682_v16  ;;  %v1353_v16 = vld [vmem:[%s1843_s2] sm:$0xff]  }
 0x1b6   : > { %1427 = vmatprep.mubr.msk.bf16.mxu0 %vm1050_vm5, %v1483_v3 }
 0x1b7   : > { %v1488_v20 = vpop.eup %1487  ;;  %1501 = vrsqrt.f32 %v698_v19 }
 0x1b8   : > { %v711_v23 = vmul.f32 %v1488_v20, %v687_v17  ;;  %v1358_v20 = vunpack.c.l.bf16 %v1368_v15 }
 0x1b9   : > { %v1490_v22 = vpop.eup %1489 }
 0x1ba   : > { %v1492_v25 = vpop.eup %1491  ;;  %v708_v26 = vmul.f32 %v1490_v22, %v684_v18  ;;  %879 = vperm.xlu1 %1472, %v711_v23   ;;  %v727_v50 = vmul.f32 %v711_v23, %v1652_v27  ;;  %v1354_v23 = vunpack.c.l.bf16 %v1353_v16 }
 0x1bb   : > { %v1494_v28 = vpop.eup %1493  ;;  %v713_v29 = vmul.f32 %v1492_v25, %v689_v21 }
 0x1bc   : > { %v1496_v30 = vpop.eup %1495  ;;  %864 = vperm.xlu0 %1471, %v708_v26   ;;  %v709_v32 = vmul.f32 %v1494_v28, %v685_v24  ;;  %v724_v37 = vmul.f32 %v708_v26, %v1654_v31  ;;  %v717_v31 = vld [vmem:[%s1847_s6 + $0x8] sm:$0xff]  ;;  %v1359_v28 = vunpack.c.h.bf16 %v1368_v15 }
 0x1bd   : > { %v1498_v34 = vpop.eup %1497  ;;  %v715_v38 = vmul.f32 %v1496_v30, %v691_v33  ;;  %v729_v57 = vmul.f32 %v713_v29, %v1658_v36  ;;  %v1482_v15 = vld [vmem:[%s1845_s4 + $0x28] sm:$0xff]  }
 0x1be   : > { %889 = vperm.xlu1 %1472, %v713_v29   ;;  %v710_v39 = vmul.f32 %v1498_v34, %v686_v35  ;;  %v1500_v42 = vpop.eup %1499  ;;  %v732_v44 = vsub.f32 %v716_v40, %v724_v37  ;;  %v725_v45 = vmul.f32 %v709_v32, %v1663_v41  ;;  %v719_v41 = vld [vmem:[%s1847_s6 + $0x18] sm:$0xff]  ;;  %v1355_v34 = vunpack.c.h.bf16 %v1353_v16  ;;  %v1485_v16 = vld [vmem:[%s1845_s4 + $0x30] sm:$0xff]  }
 0x1bf   : > { %v712_v46 = vmul.f32 %v1500_v42, %v688_v43  ;;  %v735_v56 = vsub.f32 %v719_v41, %v727_v50  ;;  %v731_v62 = vmul.f32 %v715_v38, %v1668_v47  ;;  %v1479_v47 = vld [vmem:[%s1845_s4 + $0x10] sm:$0xff]   ;;  %v1370_v42 = vld [vmem:[%s1843_s2 + $0x18] sm:$0xff]  }
 0x1c0   : > { %869 = vperm.xlu0 %1471, %v709_v32   ;;  %v733_v51 = vsub.f32 %v717_v31, %v725_v45  ;;  %v726_v54 = vmul.f32 %v710_v39, %v1672_v53  ;;  %v721_v53 = vld [vmem:[%s1847_s6 + $0x28] sm:$0xff]  ;;  %1431 = vmatprep.mubr.msk.bf16.mxu1 %vm1050_vm5, %v1479_v47  ;;  %v1366_v50 = vunpack.c.l.bf16 %v1370_v42 }
 0x1c1   : > { %v1502_v48 = vpop.eup %1501  ;;  %v728_v58 = vmul.f32 %v712_v46, %v1676_v60  ;;  %v737_v61 = vsub.f32 %v721_v53, %v729_v57  ;;  %v723_v60 = vld [vmem:[%s1847_s6 + $0x38] sm:$0xff] }
 0x1c2   : > { %899 = vperm.xlu1 %1472, %v715_v38   ;;  %v714_v52 = vmul.f32 %v1502_v48, %v690_v49  ;;  %v734_v27 = vsub.f32 %v718_v55, %v726_v54  ;;  %v739_v1 = vsub.f32 %v723_v60, %v731_v62 }
 0x1c3   : > { %v736_v63 = vsub.f32 %v720_v59, %v728_v58  ;;  %v1367_v59 = vunpack.c.h.bf16 %v1370_v42 }
 0x1c4   : > { %874 = vperm.xlu0 %1471, %v710_v39   ;;  %v730_v36 = vmul.f32 %v714_v52, %v1685_v9 }
 0x1c6   : > { %912 = vperm.xlu1 %1472, %v732_v44   ;;  %v738_v2 = vsub.f32 %v722_v0, %v730_v36  ;;  %v1369_v44 = vld [vmem:[%s1843_s2 + $0x10] sm:$0xff]  }
 0x1c7   : > { %v1363_v0 = vunpack.c.h.bf16 %v1369_v44 }
 0x1c8   : > { %884 = vperm.xlu0 %1471, %v712_v46  }
 0x1ca   : > { %917 = vperm.xlu1 %1472, %v733_v51  }
 0x1cc   : > { %894 = vperm.xlu0 %1471, %v714_v52  }
 0x1ce   : > { %927 = vperm.xlu1 %1472, %v735_v56   ;;  %v1362_v56 = vunpack.c.l.bf16 %v1369_v44 }
 0x1d0   : > { %922 = vperm.xlu0 %1471, %v734_v27  }
 0x1d2   : > { %937 = vperm.xlu1 %1472, %v737_v61  }
 0x1d4   : > { %932 = vperm.xlu0 %1471, %v736_v63  }
 0x1d6   : > { %947 = vperm.xlu1 %1472, %v739_v1  }
 0x1d8   : > { %942 = vperm.xlu0 %1471, %v738_v2  }
 0x239   : > { %v880_v5 = vpop.permute.xlu1 %879 }
 0x23b   : > { %v865_v4 = vpop.permute.xlu0 %864 }
 0x23d   : > { %v890_v7 = vpop.permute.xlu1 %889 }
 0x23f   : > { %v870_v6 = vpop.permute.xlu0 %869 }
 0x241   : > { %v900_v9 = vpop.permute.xlu1 %899 }
 0x243   : > { %v875_v8 = vpop.permute.xlu0 %874 }
 0x245   : > { %v913_v11 = vpop.permute.xlu1 %912 }
 0x247   : > { %v885_v10 = vpop.permute.xlu0 %884 }
 0x249   : > { %v918_v13 = vpop.permute.xlu1 %917 }
 0x24b   : > { %v895_v12 = vpop.permute.xlu0 %894 }
 0x24d   : > { %v928_v17 = vpop.permute.xlu1 %927 }
 0x24f   : > { %v923_v14 = vpop.permute.xlu0 %922 }
 0x251   : > { %v938_v38 = vpop.permute.xlu1 %937 }
 0x253   : > { %v933_v30 = vpop.permute.xlu0 %932 }
 0x255   : > { %v948_v62 = vpop.permute.xlu1 %947 }
 0x257   : > { %v943_v52 = vpop.permute.xlu0 %942 }
 0x280   : > { %v1413_v18 = vpop.f32.mrb[0].mxu0 }
 0x281   : > { %v904_v19 = vmul.f32 %v1413_v18, %v875_v8  ;;  %v831_v21 = vpop.f32.mrb[1].mxu0 }
 0x282   : > { %v902_v22 = vmul.f32 %v865_v4, %v831_v21  ;;  %v1414_v24 = vpop.f32.mrb[2].mxu0 }
 0x283   : > { %v952_v25 = vadd.f32 %v923_v14, %v904_v19  ;;  %v905_v26 = vmul.f32 %v1414_v24, %v880_v5  ;;  %v834_v29 = vpop.f32.mrb[3].mxu0  ;;  %v1481_v14 = vld [vmem:[%s1845_s4 + $0x20] sm:$0xff]  }
 0x284   : > { %v950_v32 = vadd.f32 %v913_v11, %v902_v22  ;;  %v903_v33 = vmul.f32 %v870_v6, %v834_v29 }
 0x285   : > { %v976_v35 = vadd.f32 %v1358_v20, %v952_v25  ;;  %v953_v37 = vadd.f32 %v928_v17, %v905_v26  ;;  %v1486_v17 = vld [vmem:[%s1845_s4 + $0x38] sm:$0xff]  }
 0x286   : > { %v974_v39 = vadd.f32 %v1354_v23, %v950_v32  ;;  %v951_v40 = vadd.f32 %v918_v13, %v903_v33  ;;  %v1484_v13 = vld [vmem:[%s1845_s4 + $0x8] sm:$0xff]  }
 0x287   : > { %v977_v43 = vadd.f32 %v1359_v28, %v953_v37  ;;  %v984_v31 = vmax.f32 %v976_v35, 0.0 }
 0x288   : > { %v975_v45 = vadd.f32 %v1355_v34, %v951_v40  ;;  %v1417_v46 = vpop.f32.mrb[4].mxu0  ;;  %v982_v54 = vmax.f32 %v974_v39, 0.0 }
 0x289   : > { %v985_v48 = vmax.f32 %v977_v43, 0.0  ;;  %v908_v49 = vmul.f32 %v1417_v46, %v895_v12  ;;  %v847_v51 = vpop.f32.mrb[5].mxu0  ;;  %v1480_v12 = vld [vmem:[%s1845_s4 + $0x18] sm:$0xff]  }
 0x28a   : > { %v983_v41 = vmax.f32 %v975_v45, 0.0  ;;  %v906_v55 = vmul.f32 %v885_v10, %v847_v51  ;;  %v1418_v57 = vpop.f32.mrb[6].mxu0 }
 0x28b   : > { %v1007_v27 = vpack.c.bf16 %v985_v48, %v984_v31  ;;  %v956_v58 = vadd.f32 %v943_v52, %v908_v49  ;;  %v909_v53 = vmul.f32 %v1418_v57, %v900_v9  ;;  %v850_v61 = vpop.f32.mrb[7].mxu0 }
 0x28c   : > { %v1006_v63 = vpack.c.bf16 %v983_v41, %v982_v54  ;;  %v954_v36 = vadd.f32 %v933_v30, %v906_v55  ;;  %v907_v60 = vmul.f32 %v890_v7, %v850_v61 }
 0x28d   : > { %v980_v1 = vadd.f32 %v1366_v50, %v956_v58  ;;  %v957_v2 = vadd.f32 %v948_v62, %v909_v53 }
 0x28e   : > { %v978_v47 = vadd.f32 %v1362_v56, %v954_v36  ;;  %v955_v3 = vadd.f32 %v938_v38, %v907_v60  ;;  %1419 = vmatprep.subr.bf16.mxu0 %v1006_v63  ;;  %1447 = vmatprep.subr.bf16.mxu1 %v1006_v63 }
 0x28f   : > { %v981_v4 = vadd.f32 %v1367_v59, %v957_v2  ;;  %1420 = vmatpush3.bf16.msra.mxu0 %v1006_v63  ;;  %1451 = vmatpush3.bf16.msra.mxu1 %v1006_v63  ;;  %v988_v6 = vmax.f32 %v980_v1, 0.0 }
 0x290   : > { %v979_v5 = vadd.f32 %v1363_v0, %v955_v3  ;;  %1421 = vmatprep.subr.bf16.mxu0 %v1007_v27  ;;  %1448 = vmatprep.subr.bf16.mxu1 %v1007_v27  ;;  %v986_v9 = vmax.f32 %v978_v47, 0.0 }
 0x291   : > { %v989_v8 = vmax.f32 %v981_v4, 0.0 }
 0x292   : > { %v987_v10 = vmax.f32 %v979_v5, 0.0 }
 0x293   : > { %v1009_v11 = vpack.c.bf16 %v989_v8, %v988_v6  ;;  %1422 = vmatpush3.bf16.msra.mxu0 %v1007_v27  ;;  %1452 = vmatpush3.bf16.msra.mxu1 %v1007_v27 }
 0x294   : > { %v1008_v7 = vpack.c.bf16 %v987_v10, %v986_v9 }
 0x296   : > { %1423 = vmatprep.subr.bf16.mxu0 %v1008_v7  ;;  %1449 = vmatprep.subr.bf16.mxu1 %v1008_v7 }
 0x297   : > { %1424 = vmatpush3.bf16.msra.mxu0 %v1008_v7  ;;  %1453 = vmatpush3.bf16.msra.mxu1 %v1008_v7 }
 0x298   : > { %1425 = vmatprep.subr.bf16.mxu0 %v1009_v11  ;;  %1450 = vmatprep.subr.bf16.mxu1 %v1009_v11 }
 0x29b   : > { %1426 = vmatpush3.bf16.msra.mxu0 %v1009_v11  ;;  %1454 = vmatpush3.bf16.msra.mxu1 %v1009_v11 }
 0x29e   : > { %1432 = vmatmul.mubr.msk.bf16.vlgmr.msra.gmra.mrb[0].mxu1 %vm1050_vm5, %v1480_v12  ;;  %1428 = vmatmul.mubr.msk.bf16.vlgmr.msra.gmra.mrb[8].mxu0 %vm1050_vm5, %v1484_v13 }
 0x29f   : > { %1435 = vmatprep.mubr.msk.bf16.mxu1 %vm1050_vm5, %v1481_v14 }
 0x2a6   : > { %1436 = vmatmul.mubr.msk.bf16.gmra.mrb[4].mxu1 %vm1050_vm5, %v1482_v15 }
 0x2a7   : > { %1439 = vmatprep.mubr.msk.bf16.mxu1 %vm1050_vm5, %v1485_v16 }
 0x2ae   : > { %1440 = vmatmul.mubr.msk.bf16.gmra.mrb[8].mxu1 %vm1050_vm5, %v1486_v17 }
 0x371   : > { %v1433_v18 = vpop.f32.mrb[0].mxu1  ;;  %v1429_v19 = vpop.f32.mrb[8].mxu0 }
 0x372   : > { %1178 = vst [vmem:[%s1848_s7 + $0x30] sm:$0xff] %v1433_v18  ;;  %v1125_v20 = vpop.f32.mrb[1].mxu1  ;;  %1174 = vst [vmem:[%s1848_s7 + $0x10] sm:$0xff] %v1429_v19  ;;  %v1109_v21 = vpop.f32.mrb[9].mxu0 }
 0x373   : > { %1176 = vst [vmem:[%s1848_s7 + $0x20] sm:$0xff] %v1125_v20  ;;  %v1434_v22 = vpop.f32.mrb[2].mxu1  ;;  %1172 = vst [vmem:[%s1848_s7] sm:$0xff] %v1109_v21  ;;  %v1430_v23 = vpop.f32.mrb[10].mxu0 }
 0x374   : > { %1179 = vst [vmem:[%s1848_s7 + $0x38] sm:$0xff] %v1434_v22  ;;  %v1128_v24 = vpop.f32.mrb[3].mxu1  ;;  %1175 = vst [vmem:[%s1848_s7 + $0x18] sm:$0xff] %v1430_v23  ;;  %v1112_v25 = vpop.f32.mrb[11].mxu0 }
 0x375   : > { %1177 = vst [vmem:[%s1848_s7 + $0x28] sm:$0xff] %v1128_v24  ;;  %1173 = vst [vmem:[%s1848_s7 + $0x8] sm:$0xff] %v1112_v25 }
 0x379   : > { %v1437_v26 = vpop.f32.mrb[4].mxu1 }
 0x37a   : > { %1182 = vst [vmem:[%s1848_s7 + $0x50] sm:$0xff] %v1437_v26  ;;  %v1141_v28 = vpop.f32.mrb[5].mxu1 }
 0x37b   : > { %1180 = vst [vmem:[%s1848_s7 + $0x40] sm:$0xff] %v1141_v28  ;;  %v1438_v29 = vpop.f32.mrb[6].mxu1 }
 0x37c   : > { %1183 = vst [vmem:[%s1848_s7 + $0x58] sm:$0xff] %v1438_v29  ;;  %v1144_v30 = vpop.f32.mrb[7].mxu1 }
 0x37d   : > { %1181 = vst [vmem:[%s1848_s7 + $0x48] sm:$0xff] %v1144_v30 }
 0x381   : > { %v1441_v32 = vpop.f32.mrb[8].mxu1 }
 0x382   : > { %1186 = vst [vmem:[%s1848_s7 + $0x70] sm:$0xff] %v1441_v32  ;;  %v1157_v33 = vpop.f32.mrb[9].mxu1 }
 0x383   : > { %1184 = vst [vmem:[%s1848_s7 + $0x60] sm:$0xff] %v1157_v33  ;;  %v1442_v34 = vpop.f32.mrb[10].mxu1 }
 0x384   : > { %1187 = vst [vmem:[%s1848_s7 + $0x78] sm:$0xff] %v1442_v34  ;;  %v1160_v35 = vpop.f32.mrb[11].mxu1 }
 0x385   : > { %1185 = vst [vmem:[%s1848_s7 + $0x68] sm:$0xff] %v1160_v35 }
 0x386 PF: > { %s17_s24 = sadd.s32 1, %s1509_s24  }
 0x387   : > { %p14_p8 = scmp.ge.s32.totalorder %s17_s24, 4  }
 0x389   :  { %16 = sbr.rel (!%p14_p8) target bundleno = 1 (0x1), region = 96 }

</bundles_post_ra>
